<compile_context>
chip_gen: v6e
topology: v6e:2x2x1
jax: 0.10.0
libtpu: 0.0.40
codegen_flags: <defaults>
</compile_context>

<pallas_src>
import functools

import jax
import jax.numpy as jnp
from jax.experimental import pallas as pl
from jax.experimental.pallas import tpu as pltpu


# ----------------------------- Pallas kernel --------------------------------
def xcy_kernel(w_ref, spa_ref, a_ref, b_ref, wc_ref, scale_ref, shift_ref, out_ref,
               *, tb_chunk, n_tb, mxu_dtype):
    # w_ref     : (2,)  f32 SMEM  -- [0.5*fw0, 0.5*fw1]  (relu6-normalized, pre-halved)
    # spa_ref   : (1, tile_ta) i32 -- precomputed (data-independent) spatial argmax
    # a_ref     : (1, C, tile_ta)  -- tokens 0,4,8,...      (channel-major)
    # b_ref     : (1, C, Tb)       -- tokens i with i%4!=0  (channel-major, resident)
    # wc_ref    : (Cout, C)        -- 1x1 conv weight
    # scale_ref : (Cout, 1)        -- folded BN scale
    # shift_ref : (Cout, 1)        -- folded BN shift
    # out_ref   : (1, Cout, tile_ta)
    ta = a_ref.shape[-1]

    w0h = w_ref[0]                 # 0.5 * fuse_w[0]
    w1h = w_ref[1]                 # 0.5 * fuse_w[1]
    s_a = w0h + w1h                # weight on the 'a' token in both merges

    a = a_ref[0]                   # (C, tile_ta)  -- raw, un-normalized (argmax-invariant)
    spa_idx = spa_ref[...]         # (1, tile_ta) i32

    # Local row iota over one Tb chunk, reused by both passes.
    row_local = jax.lax.broadcasted_iota(jnp.int32, (tb_chunk, ta), 0)

    def b_chunk(c):
        start = c * tb_chunk
        if n_tb > 1:
            start = pl.multiple_of(start, tb_chunk)   # lane-aligned chunk starts
        return b_ref[0, :, pl.ds(start, tb_chunk)]    # (C, tb_chunk)

    # ---- pass 1: online first-occurrence argmax of <b/||b||, a> over Tb chunks ----
    # Kept in f32 so near-tie argmax matches the f32 reference exactly.
    def sim_step(c, carry):
        run_max, run_idx = carry
        b_c = b_chunk(c)
        b_n = b_c * jax.lax.rsqrt(jnp.sum(b_c * b_c, axis=0, keepdims=True))  # EUP rsqrt
        simT = jax.lax.dot_general(b_n, a, (((0,), (0,)), ((), ())),
                                   preferred_element_type=jnp.float32)        # (tb_chunk, ta)
        c_max = jnp.max(simT, axis=0, keepdims=True)                          # (1, ta)
        c_idx = jnp.min(jnp.where(simT == c_max, row_local, tb_chunk),
                        axis=0, keepdims=True) + c * tb_chunk                 # (1, ta) i32
        better = c_max > run_max          # strict '>' keeps first occurrence across chunks
        return jnp.where(better, c_max, run_max), jnp.where(better, c_idx, run_idx)

    init = (jnp.full((1, ta), -jnp.inf, jnp.float32),
            jnp.zeros((1, ta), jnp.int32))
    if n_tb == 1:
        _, sim_idx = sim_step(0, init)
    else:
        _, sim_idx = jax.lax.fori_loop(0, n_tb, sim_step, init)

    # ---- pass 2: fused merge via ONE weighted one-hot selection matmul per chunk ----
    def sel_step(c, fused):
        b_c = b_chunk(c)
        row_g = row_local + c * tb_chunk
        combT = (jnp.where(row_g == sim_idx, w0h, 0.0)
                 + jnp.where(row_g == spa_idx, w1h, 0.0))                     # (tb_chunk, ta)
        return fused + jnp.dot(b_c.astype(mxu_dtype), combT.astype(mxu_dtype),
                               preferred_element_type=jnp.float32)            # (C, ta)

    fused0 = s_a * a
    if n_tb == 1:
        fused = sel_step(0, fused0)
    else:
        fused = jax.lax.fori_loop(0, n_tb, sel_step, fused0)

    # ---- 1x1 conv + folded BN + SiLU; (Cout, tile_ta) output is lane-dense ----
    y = jnp.dot(wc_ref[...].astype(mxu_dtype), fused.astype(mxu_dtype),
                preferred_element_type=jnp.float32)                           # (Cout, ta)
    y = y * scale_ref[...] + shift_ref[...]
    out_ref[0] = (y * (1.0 / (1.0 + jnp.exp(-y)))).astype(out_ref.dtype)


# ------------------------------ JAX wrapper ----------------------------------
def xcy_forward(x, params, *, mxu_bf16=False):
    B, C, H, W = x.shape
    assert H % 2 == 0 and W % 2 == 0, "spatial dims must be even"
    T = H * W
    assert T % 4 == 0, "token count must be divisible by 4"
    Ta, Tb = T // 4, (T // 4) * 3

    # --- token split via reshape + static slices (no gather, no transpose) ---
    xg = x.reshape(B, C, Ta, 4)
    x_a = xg[:, :, :, 0]                              # (B, C, Ta)  tokens 0,4,8,...
    x_b = xg[:, :, :, 1:].reshape(B, C, Tb)           # (B, C, Tb)  tokens i % 4 != 0

    # --- pad the merged-token axis to a lane-dense multiple of 128; slice after ---
    Ta_pad = max(128, ((Ta + 127) // 128) * 128)
    if Ta_pad != Ta:
        x_a = jnp.pad(x_a, ((0, 0), (0, 0), (0, Ta_pad - Ta)))

    # --- spatial argmax is data-independent -> precompute once (glue) ---
    a_idx = jnp.arange(0, T, 4, dtype=jnp.int32)                              # (Ta,)
    b_idx = (4 * jnp.arange(Ta, dtype=jnp.int32)[:, None]
             + jnp.arange(1, 4, dtype=jnp.int32)[None, :]).reshape(-1)        # (Tb,)
    width = int(float(T) ** 0.5)  # TODO(synk): assumes H == W (same as reference/original)
    a_co = jnp.stack([a_idx // width, a_idx % width], -1).astype(jnp.float32)
    b_co = jnp.stack([b_idx // width, b_idx % width], -1).astype(jnp.float32)
    dist = jnp.sqrt(jnp.sum((a_co[:, None, :] - b_co[None, :, :]) ** 2, -1))
    spa_idx = jnp.argmax(1.0 / (dist + 1e-6), axis=-1).astype(jnp.int32)[None, :]  # (1, Ta)
    if Ta_pad != Ta:
        spa_idx = jnp.pad(spa_idx, ((0, 0), (0, Ta_pad - Ta)))

    # --- AdaptiveFusion weights: relu6 + normalize; pre-fold the 0.5 merge factor ---
    w = jnp.clip(params["fusion_w"], 0.0, 6.0)
    w_half = (0.5 * w / (jnp.sum(w) + 1e-8)).astype(jnp.float32)              # (2,)

    # --- 1x1 conv (no bias) + folded BatchNorm ---
    # TODO(synk): BatchNorm is evaluated in inference mode (running stats), not batch stats.
    out_ch = params["conv_w"].shape[0]
    wc = params["conv_w"].reshape(out_ch, C).astype(jnp.float32)              # (Cout, C)
    bn_scale = params["bn_gamma"] / jnp.sqrt(params["bn_var"] + params["bn_eps"])
    bn_shift = params["bn_beta"] - params["bn_mean"] * bn_scale
    bn_scale = bn_scale.astype(jnp.float32)[:, None]                          # (Cout, 1)
    bn_shift = bn_shift.astype(jnp.float32)[:, None]                          # (Cout, 1)

    # --- generation-aware scoped-VMEM limit (64 MiB on v7x, 128 MiB on v5e/v6e) ---
    try:
        vmem_cap = pltpu.get_tpu_info().vmem_capacity_bytes
    except Exception:
        vmem_cap = 64 * 1024 * 1024
    vmem_limit = max(32 * 1024 * 1024,
                     min(int(vmem_cap * 5 // 8), 100 * 1024 * 1024))

    # --- Tb chunking: bounds the quadratic (tb_chunk, tile_ta) temporaries.
    #     Chunk starts stay multiples of 128 so lane slices are tile-aligned. ---
    tb_chunk = Tb
    if Tb > 1024:
        for cand in (1024, 768, 512, 384, 256, 128):
            if Tb % cand == 0:
                tb_chunk = cand
                break
    n_tb = Tb // tb_chunk

    # --- tile_ta: largest lane-aligned tile whose rough per-step footprint fits ---
    budget = int(0.6 * vmem_limit)
    tile_ta = 128
    for cand in (512, 256, 128):
        if Ta_pad % cand != 0:
            continue
        blocks = 4 * 2 * (C * cand + out_ch * cand + C * Tb)     # double-buffered f32 blocks
        temps = 4 * (3 * tb_chunk * cand + 4 * C * cand)         # simT/combT/iota + fused/a
        if blocks + temps <= budget:
            tile_ta = cand
            break
    n_ta = Ta_pad // tile_ta

    kernel = functools.partial(
        xcy_kernel, tb_chunk=tb_chunk, n_tb=n_tb,
        mxu_dtype=jnp.bfloat16 if mxu_bf16 else jnp.float32)

    out = pl.pallas_call(
        kernel,
        out_shape=jax.ShapeDtypeStruct((B, out_ch, Ta_pad), x.dtype),
        grid=(B, n_ta),                                                      # batch sharded too
        in_specs=[
            pl.BlockSpec(memory_space=pltpu.MemorySpace.SMEM),               # fuse weights (2,)
            pl.BlockSpec((1, tile_ta), lambda b, i: (0, i)),                 # spatial argmax
            pl.BlockSpec((1, C, tile_ta), lambda b, i: (b, 0, i)),           # x_a tile
            pl.BlockSpec((1, C, Tb), lambda b, i: (b, 0, 0)),                # x_b (per-batch resident)
            pl.BlockSpec((out_ch, C), lambda b, i: (0, 0)),                  # conv weight
            pl.BlockSpec((out_ch, 1), lambda b, i: (0, 0)),                  # BN scale
            pl.BlockSpec((out_ch, 1), lambda b, i: (0, 0)),                  # BN shift
        ],
        out_specs=pl.BlockSpec((1, out_ch, tile_ta), lambda b, i: (b, 0, i)),
        compiler_params=pltpu.CompilerParams(
            dimension_semantics=("parallel", "parallel"),
            vmem_limit_bytes=vmem_limit,
        ),
    )(w_half, spa_idx, x_a, x_b, wc, bn_scale, bn_shift)

    return out[:, :, :Ta].reshape(B, out_ch, H // 2, W // 2)


# --------------------------- pure-JAX reference -------------------------------
def xcy_reference(x, params):
    B, C, H, W = x.shape
    T = H * W
    x_flat = jnp.transpose(x.reshape(B, C, T), (0, 2, 1))
    a_idx = jnp.arange(0, T, 4)
    b_idx = jnp.asarray([i for i in range(T) if i % 4 != 0])
    metric = x_flat / jnp.linalg.norm(x_flat, axis=-1, keepdims=True)
    a_m, b_m = metric[:, a_idx, :], metric[:, b_idx, :]
    width = int(float(T) ** 0.5)
    a_co = jnp.stack([a_idx // width, a_idx % width], -1).astype(jnp.float32)
    b_co = jnp.stack([b_idx // width, b_idx % width], -1).astype(jnp.float32)
    sim = jnp.einsum("bic,bjc->bij", a_m, b_m)
    dist = jnp.sqrt(jnp.sum((a_co[:, None, :] - b_co[None, :, :]) ** 2, -1))
    spa_scores = 1.0 / (dist + 1e-6)
    sim_idx = jnp.argmax(sim, axis=-1)                              # (B, Ta)
    spa_idx = jnp.argmax(spa_scores, axis=-1)                       # (Ta,)
    x_a, x_b = x_flat[:, a_idx, :], x_flat[:, b_idx, :]
    sel_sim = jnp.take_along_axis(x_b, sim_idx[..., None], axis=1)
    sel_spa = x_b[:, spa_idx, :]
    m_sim = (x_a + sel_sim) / 2
    m_spa = (x_a + sel_spa) / 2
    w = jnp.clip(params["fusion_w"], 0.0, 6.0)
    fw = w / (jnp.sum(w) + 1e-8)
    fused = fw[0] * m_sim + fw[1] * m_spa                           # (B, Ta, C)
    xr = jnp.transpose(fused, (0, 2, 1)).reshape(B, C, H // 2, W // 2)
    out_ch = params["conv_w"].shape[0]
    wc = params["conv_w"].reshape(out_ch, C)
    y = jnp.einsum("oc,bchw->bohw", wc, xr)
    scale = params["bn_gamma"] / jnp.sqrt(params["bn_var"] + params["bn_eps"])
    shift = params["bn_beta"] - params["bn_mean"] * scale
    y = y * scale[None, :, None, None] + shift[None, :, None, None]
    return y * jax.nn.sigmoid(y)


if __name__ == "__main__":
    key = jax.random.PRNGKey(0)
    k_x, k_w = jax.random.split(key)

    B, in_ch, H, W = 2, 4, 16, 16
    out_ch = 8

    x = jax.random.normal(k_x, (B, in_ch, H, W), dtype=jnp.float32)

    params = {
        "conv_w": 0.1 * jax.random.normal(k_w, (out_ch, in_ch, 1, 1), jnp.float32),
        "fusion_w": jnp.ones((2,), jnp.float32),          # nn.Parameter(torch.ones(2))
        "bn_gamma": jnp.ones((out_ch,), jnp.float32),
        "bn_beta": jnp.zeros((out_ch,), jnp.float32),
        "bn_mean": jnp.zeros((out_ch,), jnp.float32),
        "bn_var": jnp.ones((out_ch,), jnp.float32),
        "bn_eps": jnp.float32(1e-3),
    }

    out = jax.block_until_ready(xcy_forward(x, params))
    ref = jax.block_until_ready(xcy_reference(x, params))

    assert out.shape == (B, out_ch, H // 2, W // 2), out.shape
    assert jnp.all(jnp.isfinite(out))
    assert jnp.allclose(out, ref, rtol=1e-3, atol=1e-3), float(jnp.max(jnp.abs(out - ref)))

    print("KERNEL_OK")
</pallas_src>

<mosaic_0001>
module attributes {stable_mosaic.version = 11 : i64} {
  func.func @xcy_kernel(%arg0: i32, %arg1: i32, %arg2: memref<2xf32, #tpu.memory_space<smem>>, %arg3: memref<1x128xi32, #tpu.memory_space<vmem>>, %arg4: memref<1x4x128xf32, #tpu.memory_space<vmem>>, %arg5: memref<1x4x192xf32, #tpu.memory_space<vmem>>, %arg6: memref<8x4xf32, #tpu.memory_space<vmem>>, %arg7: memref<8x1xf32, #tpu.memory_space<vmem>>, %arg8: memref<8x1xf32, #tpu.memory_space<vmem>>, %arg9: memref<1x8x128xf32, #tpu.memory_space<vmem>>) attributes {dimension_semantics = [#tpu.dimension_semantics<parallel>, #tpu.dimension_semantics<parallel>], iteration_bounds = array<i64: 2, 1>, scalar_prefetch = 0 : i64, scratch_operands = 0 : i64, tpu.core_type = #tpu.core_type<tc>, window_params = [{transform_indices = @transform_0, window_bounds = array<i64: 2>}, {transform_indices = @transform_1, window_bounds = array<i64: 1, 128>}, {transform_indices = @transform_2, window_bounds = array<i64: 1, 4, 128>}, {transform_indices = @transform_3, window_bounds = array<i64: 1, 4, 192>}, {pipeline_mode = #tpu.pipeline_mode<synchronous>, transform_indices = @transform_4, window_bounds = array<i64: 8, 4>}, {pipeline_mode = #tpu.pipeline_mode<synchronous>, transform_indices = @transform_5, window_bounds = array<i64: 8, 1>}, {pipeline_mode = #tpu.pipeline_mode<synchronous>, transform_indices = @transform_6, window_bounds = array<i64: 8, 1>}, {transform_indices = @transform_7, window_bounds = array<i64: 1, 8, 128>}]} {
    %c0 = arith.constant 0 : index
    %0 = memref.load %arg2[%c0] : memref<2xf32, #tpu.memory_space<smem>>
    %c1 = arith.constant 1 : index
    %1 = memref.load %arg2[%c1] : memref<2xf32, #tpu.memory_space<smem>>
    %2 = arith.addf %0, %1 : f32
    %c0_0 = arith.constant 0 : index
    %c0_1 = arith.constant 0 : index
    %c0_2 = arith.constant 0 : index
    %3 = vector.load %arg4[%c0_0, %c0_1, %c0_2] : memref<1x4x128xf32, #tpu.memory_space<vmem>>, vector<1x4x128xf32>
    %4 = vector.shape_cast %3 : vector<1x4x128xf32> to vector<4x128xf32>
    %c0_3 = arith.constant 0 : index
    %c0_4 = arith.constant 0 : index
    %5 = vector.load %arg3[%c0_3, %c0_4] : memref<1x128xi32, #tpu.memory_space<vmem>>, vector<1x128xi32>
    %6 = tpu.iota {dimensions = array<i32: 0>} : vector<192x128xi32>
    %cst = arith.constant 0xFF800000 : f32
    %7 = vector.broadcast %cst : f32 to vector<1x128xf32>
    %c0_i32 = arith.constant 0 : i32
    %8 = vector.broadcast %c0_i32 : i32 to vector<1x128xi32>
    %c0_5 = arith.constant 0 : index
    %c0_6 = arith.constant 0 : index
    %c0_7 = arith.constant 0 : index
    %9 = vector.load %arg5[%c0_5, %c0_6, %c0_7] : memref<1x4x192xf32, #tpu.memory_space<vmem>>, vector<1x4x192xf32>
    %10 = vector.shape_cast %9 : vector<1x4x192xf32> to vector<4x192xf32>
    %11 = arith.mulf %10, %10 : vector<4x192xf32>
    %cst_8 = arith.constant dense<0.000000e+00> : vector<192xf32>
    %12 = vector.multi_reduction <add>, %11, %cst_8 [0] : vector<4x192xf32> to vector<192xf32>
    %13 = vector.shape_cast %12 : vector<192xf32> to vector<1x192xf32>
    %14 = math.rsqrt %13 : vector<1x192xf32>
    %15 = vector.broadcast %14 : vector<1x192xf32> to vector<4x192xf32>
    %16 = arith.mulf %10, %15 : vector<4x192xf32>
    %cst_9 = arith.constant dense<0.000000e+00> : vector<192x128xf32>
    %17 = tpu.matmul %16, %4, %cst_9 {dimension_numbers = #tpu.dot_dimension_numbers<[0], [0], [1], [1], [0, 1, 1, 1], [], []>} : vector<4x192xf32>, vector<4x128xf32>, vector<192x128xf32> -> vector<192x128xf32>
    %cst_10 = arith.constant dense<0xFF800000> : vector<128xf32>
    %18 = vector.multi_reduction <maximumf>, %17, %cst_10 [0] : vector<192x128xf32> to vector<128xf32>
    %19 = vector.shape_cast %18 : vector<128xf32> to vector<1x128xf32>
    %20 = vector.broadcast %19 : vector<1x128xf32> to vector<192x128xf32>
    %21 = arith.cmpf oeq, %17, %20 : vector<192x128xf32>
    %c192_i32 = arith.constant 192 : i32
    %22 = vector.broadcast %c192_i32 : i32 to vector<192x128xi32>
    %23 = arith.select %21, %6, %22 : vector<192x128xi1>, vector<192x128xi32>
    %cst_11 = arith.constant dense<2147483647> : vector<128xi32>
    %24 = vector.multi_reduction <minsi>, %23, %cst_11 [0] : vector<192x128xi32> to vector<128xi32>
    %25 = vector.shape_cast %24 : vector<128xi32> to vector<1x128xi32>
    %c0_i32_12 = arith.constant 0 : i32
    %26 = vector.broadcast %c0_i32_12 : i32 to vector<1x128xi32>
    %27 = arith.addi %25, %26 : vector<1x128xi32>
    %28 = arith.cmpf ogt, %19, %7 : vector<1x128xf32>
    %29 = arith.select %28, %27, %8 : vector<1x128xi1>, vector<1x128xi32>
    %30 = vector.broadcast %2 : f32 to vector<4x128xf32>
    %31 = arith.mulf %30, %4 : vector<4x128xf32>
    %c0_13 = arith.constant 0 : index
    %c0_14 = arith.constant 0 : index
    %c0_15 = arith.constant 0 : index
    %32 = vector.load %arg5[%c0_13, %c0_14, %c0_15] : memref<1x4x192xf32, #tpu.memory_space<vmem>>, vector<1x4x192xf32>
    %33 = vector.shape_cast %32 : vector<1x4x192xf32> to vector<4x192xf32>
    %c0_i32_16 = arith.constant 0 : i32
    %34 = vector.broadcast %c0_i32_16 : i32 to vector<192x128xi32>
    %35 = arith.addi %6, %34 : vector<192x128xi32>
    %36 = vector.broadcast %29 : vector<1x128xi32> to vector<192x128xi32>
    %37 = arith.cmpi eq, %35, %36 : vector<192x128xi32>
    %cst_17 = arith.constant 0.000000e+00 : f32
    %38 = vector.broadcast %0 : f32 to vector<192x128xf32>
    %39 = vector.broadcast %cst_17 : f32 to vector<192x128xf32>
    %40 = arith.select %37, %38, %39 : vector<192x128xi1>, vector<192x128xf32>
    %41 = vector.broadcast %5 : vector<1x128xi32> to vector<192x128xi32>
    %42 = arith.cmpi eq, %35, %41 : vector<192x128xi32>
    %cst_18 = arith.constant 0.000000e+00 : f32
    %43 = vector.broadcast %1 : f32 to vector<192x128xf32>
    %44 = vector.broadcast %cst_18 : f32 to vector<192x128xf32>
    %45 = arith.select %42, %43, %44 : vector<192x128xi1>, vector<192x128xf32>
    %46 = arith.addf %40, %45 : vector<192x128xf32>
    %cst_19 = arith.constant dense<0.000000e+00> : vector<4x128xf32>
    %47 = tpu.matmul %33, %46, %cst_19 {dimension_numbers = #tpu.dot_dimension_numbers<[1], [0], [0], [1], [0, 0, 1, 1], [], []>} : vector<4x192xf32>, vector<192x128xf32>, vector<4x128xf32> -> vector<4x128xf32>
    %48 = arith.addf %31, %47 : vector<4x128xf32>
    %c0_20 = arith.constant 0 : index
    %c0_21 = arith.constant 0 : index
    %49 = vector.load %arg6[%c0_20, %c0_21] : memref<8x4xf32, #tpu.memory_space<vmem>>, vector<8x4xf32>
    %cst_22 = arith.constant dense<0.000000e+00> : vector<8x128xf32>
    %50 = tpu.matmul %49, %48, %cst_22 {dimension_numbers = #tpu.dot_dimension_numbers<[1], [0], [0], [1], [0, 0, 1, 1], [], []>} : vector<8x4xf32>, vector<4x128xf32>, vector<8x128xf32> -> vector<8x128xf32>
    %c0_23 = arith.constant 0 : index
    %c0_24 = arith.constant 0 : index
    %51 = vector.load %arg7[%c0_23, %c0_24] : memref<8x1xf32, #tpu.memory_space<vmem>>, vector<8x1xf32>
    %52 = vector.broadcast %51 : vector<8x1xf32> to vector<8x128xf32>
    %53 = arith.mulf %50, %52 : vector<8x128xf32>
    %c0_25 = arith.constant 0 : index
    %c0_26 = arith.constant 0 : index
    %54 = vector.load %arg8[%c0_25, %c0_26] : memref<8x1xf32, #tpu.memory_space<vmem>>, vector<8x1xf32>
    %55 = vector.broadcast %54 : vector<8x1xf32> to vector<8x128xf32>
    %56 = arith.addf %53, %55 : vector<8x128xf32>
    %cst_27 = arith.constant 0.000000e+00 : f32
    %57 = vector.broadcast %cst_27 : f32 to vector<8x128xf32>
    %58 = arith.subf %57, %56 : vector<8x128xf32>
    %59 = math.exp %58 : vector<8x128xf32>
    %cst_28 = arith.constant 1.000000e+00 : f32
    %60 = vector.broadcast %cst_28 : f32 to vector<8x128xf32>
    %61 = arith.addf %60, %59 : vector<8x128xf32>
    %cst_29 = arith.constant 1.000000e+00 : f32
    %62 = vector.broadcast %cst_29 : f32 to vector<8x128xf32>
    %63 = arith.divf %62, %61 : vector<8x128xf32>
    %64 = arith.mulf %56, %63 : vector<8x128xf32>
    %c0_30 = arith.constant 0 : index
    %c0_31 = arith.constant 0 : index
    %c0_32 = arith.constant 0 : index
    %65 = vector.load %arg9[%c0_30, %c0_31, %c0_32] : memref<1x8x128xf32, #tpu.memory_space<vmem>>, vector<1x8x128xf32>
    %66 = vector.shape_cast %65 : vector<1x8x128xf32> to vector<8x128xf32>
    %67 = vector.shape_cast %64 : vector<8x128xf32> to vector<1x8x128xf32>
    tpu.vector_store %arg9[%c0_30, %c0_31, %c0_32], %67 {strides = array<i32>} : memref<1x8x128xf32, #tpu.memory_space<vmem>>, vector<1x8x128xf32>,
    return
  }
  func.func @transform_0(%arg0: i32, %arg1: i32) -> i32 {
    %c0_i32 = arith.constant 0 : i32
    %c0_i32_0 = arith.constant 0 : i32
    return %c0_i32 : i32
  }
  func.func @transform_1(%arg0: i32, %arg1: i32) -> (i32, i32) {
    %c0_i32 = arith.constant 0 : i32
    %c0_i32_0 = arith.constant 0 : i32
    return %c0_i32, %arg1 : i32, i32
  }
  func.func @transform_2(%arg0: i32, %arg1: i32) -> (i32, i32, i32) {
    %c0_i32 = arith.constant 0 : i32
    %c0_i32_0 = arith.constant 0 : i32
    return %arg0, %c0_i32, %arg1 : i32, i32, i32
  }
  func.func @transform_3(%arg0: i32, %arg1: i32) -> (i32, i32, i32) {
    %c0_i32 = arith.constant 0 : i32
    %c0_i32_0 = arith.constant 0 : i32
    %c0_i32_1 = arith.constant 0 : i32
    return %arg0, %c0_i32, %c0_i32_0 : i32, i32, i32
  }
  func.func @transform_4(%arg0: i32, %arg1: i32) -> (i32, i32) {
    %c0_i32 = arith.constant 0 : i32
    %c0_i32_0 = arith.constant 0 : i32
    %c0_i32_1 = arith.constant 0 : i32
    return %c0_i32, %c0_i32_0 : i32, i32
  }
  func.func @transform_5(%arg0: i32, %arg1: i32) -> (i32, i32) {
    %c0_i32 = arith.constant 0 : i32
    %c0_i32_0 = arith.constant 0 : i32
    %c0_i32_1 = arith.constant 0 : i32
    return %c0_i32, %c0_i32_0 : i32, i32
  }
  func.func @transform_6(%arg0: i32, %arg1: i32) -> (i32, i32) {
    %c0_i32 = arith.constant 0 : i32
    %c0_i32_0 = arith.constant 0 : i32
    %c0_i32_1 = arith.constant 0 : i32
    return %c0_i32, %c0_i32_0 : i32, i32
  }
  func.func @transform_7(%arg0: i32, %arg1: i32) -> (i32, i32, i32) {
    %c0_i32 = arith.constant 0 : i32
    %c0_i32_0 = arith.constant 0 : i32
    return %arg0, %c0_i32, %arg1 : i32, i32, i32
  }
}

</mosaic_0001>

<bundles_post_ra>
// kernel: tpu_custom_call.1
= control target key start
LH: loop header
LB: loop body
LE: loop exit
PB: predicated region body
PF: predicated region fallthrough
CT: control target
= control target key end

     0   :  { %12 = vsyncpa [#allocation4], 0  ;;  %s2294_s0 = inlined_call_operand.vmem [shape: f32[2], index: 0, kind: input, shape index: {}]   ;;  %s2295_s1 = inlined_call_operand.vmem [shape: s32[1,128], index: 1, kind: input, shape index: {}]   ;;  %s2296_s2 = inlined_call_operand.vmem [shape: f32[2,4,128], index: 2, kind: input, shape index: {}]   ;;  %s2297_s3 = inlined_call_operand.vmem [shape: f32[2,4,192], index: 3, kind: input, shape index: {}]   ;;  %s2298_s4 = inlined_call_operand.vmem [shape: f32[8,4], index: 4, kind: input, shape index: {}]   ;;  %s2299_s5 = inlined_call_operand.vmem [shape: f32[8,1], index: 5, kind: input, shape index: {}]   ;;  %s2300_s6 = inlined_call_operand.vmem [shape: f32[8,1], index: 6, kind: input, shape index: {}]   ;;  %s2301_s7 = inlined_call_operand.hbm [shape: f32[2,8,128], index: 7, kind: output, shape index: {}]  }
   0x1   :  { %13 = vsyncpa [#allocation3], 0 }
   0x2   :  { %15 = vsyncpa [#allocation3 + $0x1], 0  ;;  %s1631_s24 = smov 0   ;;  %s1633_s25 = smov 0  }
   0x3   :  { %s1635_s26 = smov 0   ;;  %s1637_s27 = smov 0  }
   0x4   :  { %s1639_s28 = smov 0   ;;  %s1641_s29 = smov 0  }
   0x5 LB: > { %s1292_s30 = sadd.s32 4294967295, %s1584_s29   ;;  %s1293_s8 = sadd.s32 4294967294, %s1584_s29   ;;  %s1584_s29 = sphi %s1641_s29, %s21_s29   ;;  %s1580_s28 = sphi %s1639_s28, %s2322_s28   ;;  %s1576_s27 = sphi %s1637_s27, %s2321_s27   ;;  %s1572_s26 = sphi %s1635_s26, %s2320_s26   ;;  %s1568_s25 = sphi %s1633_s25, %s2319_s25   ;;  %s1564_s24 = sphi %s1631_s24, %s2318_s24  }
   0x6   : > { %s33_s9 = sadd.s32 1, %s1580_s28  ;;  %s206_s10 = sadd.s32 1, %s1572_s26 }
   0x7   : > { %p35_p0 = scmp.ge.s32.totalorder %s33_s9, 2  ;;  %p216_p1 = scmp.ne.s32.totalorder %s1572_s26, %s1568_s25 }
   0x8   : > { %p217_p2 = scmp.eq.s32.totalorder %s1292_s30, 1  ;;  %p222_p3 = scmp.ne.s32.totalorder %s1568_s25, %s1564_s24 }
   0x9   : > { %s2324_s9 = smov (%p35_p0, %s33_s9), 0  ;;  %p223_p5 = scmp.eq.s32.totalorder %s1293_s8, 1 }
   0xa   : > { %p1671_p4 = por %p217_p2, %p216_p1  ;;  %s201_s12 = ssub.s32 %s1580_s28, %s2324_s9 }
   0xb   : > { %p1294_p6 = scmp.ge.s32.totalorder %s1584_s29, 1  ;;  %p204_p7 = scmp.eq.s32.totalorder %s201_s12, 0 }
   0xc   : > { %p1678_p8 = por %p223_p5, %p222_p3  ;;  %p230_p9 = scmp.lt.s32.totalorder %s1584_s29, 3 }
   0xd   : > { %s1684_s14 = scalar_select %p204_p7, %s1572_s26, %s206_s10  }
   0xe   : > { %p1686_p10 = pnand %p1294_p6, %p230_p9  ;;  %p1690_p11 = scmp.eq.s32.totalorder %s1292_s30, 0 }
   0xf   : > { %s243_s19 = sshll.u32 %s2294_s0, 4  ;;  %s244_s19 = int_to_ptr.vmem [resolvable:$true] %s243_s19 }
  0x10   : > { %p1415_p12 = pneg %p1686_p10  ;;  %s1489_s20 = scalar_lea.vmem %s244_s19, 16 }
  0x11   : > { %p1490_p0 = scmp.ne.s32.totalorder %s244_s19, %s1489_s20  ;;  %p1497_p5 = scmp.lt.s32.totalorder %s244_s19, %s244_s19 }
  0x12   : > { %p1416_p13 = pnand %p1690_p11, %p1415_p12  ;;  %p1498_p6 = scmp.lt.s32.totalorder %s1489_s20, %s1489_s20 }
  0x14   : > { %p1491_p1 = pneg %p1416_p13  ;;  %p1499_p7 = por %p1498_p6, %p1497_p5 }
  0x16   : > { %p1492_p2 = pnand %p1491_p1, %p1490_p0 }
  0x18   : > { %p1493_p3 = pneg %p1492_p2 }
  0x1a   : > { %p1500_p9 = pnand %p1499_p7, %p1493_p3 }
  0x1c   : > { %1503 = shalt.err (!%p1500_p9)
}
  0x1d   : > { %s1586_s21 = smov [#allocation2]   ;;  %289 = sbr.rel (%p1686_p10) target bundleno = 1041 (0x411), region = 48 }
  0x1e   : > { %1418 = dma.vmem_to_smem (!%p1416_p13), %s244_s19, 16, %s1586_s21, [#allocation4]  }
  0x22   : > { %1555 = dma.done.wait (%p1690_p11), [#allocation4], 16  }
  0x23   : > { %1557 = vsyncadd (%p1690_p11), [#allocation4], 4294967280 }
  0x24   : > { %295 = sfence }
  0x25   : > { %p335_p12 = scmp.lt.s32.totalorder %s1576_s27, 1  ;;  %vm2303_vm0 = vcmask 1043456   ;;  %vm390_vm1 = vcmask 519168   ;;  %vm2302_vm2 = vcmask 31744   ;;  %v1587_v47 = vmov 0.0   ;;  %s1787_s18 = sld [smem:[#allocation2]] }
  0x26   : > { %1000 = vmatprep.subr.mxu1 %v1587_v47  ;;  %s1789_s19 = sld [smem:[#allocation2 + $0x1]]  ;;  %vm997_vm3 = vcmask 523264   ;;  %s329_s16 = sand.u32 1, %s1568_s25  }
  0x27   : > { %s1709_s22 = scalar_select %p335_p12, %s1576_s27, 1 }
  0x28   : > { %s1171_s30 = scalar_lea.sflag [#allocation3], %s329_s16 }
  0x29   : > { %s1338_s23 = sshll.u32 %s1709_s22, 3  ;;  %s1301_s12 = sshll.u32 %s1709_s22, 2 }
  0x2a   : > { %s346_s10 = scalar_lea.vmem %s2297_s3, %s1338_s23  ;;  %s341_s17 = scalar_lea.vmem %s2296_s2, %s1301_s12 }
  0x2b   : > { %v1715_v0 = vld [vmem:[%s346_s10] sm:$0xff]  ;;  %s1590_s10 = smov [#allocation5]  }
  0x2c   : > { %v378_v1 = vmul.f32 %v1715_v0, %v1715_v0  ;;  %v1725_v21 = vld [vmem:[%s341_s17] sm:$0xf]  ;;  %s349_s20 = sadd.f32 %s1789_s19, %s1787_s18  ;;  %s1300_s17 = sshll.u32 %s329_s16, 3 }
  0x2d   : > { %1366 = vmatprep.subr.msk.mxu0 %vm2303_vm0, %v1725_v21  ;;  %s1508_s12 = sshll.u32 %s1590_s10, 4  ;;  %s1509_s12 = int_to_ptr.vmem [resolvable:$false] %s1508_s12 }
  0x2e   : > { %v380_v2 = vcombine.high %v378_v1, %v378_v1  ;;  %v383_v3 = vsel %vm2303_vm0, %v378_v1, 0.0  ;;  %1367 = vmatpush3.msk.msra.mxu0 %vm2303_vm0, %v1725_v21 }
  0x2f   : > { %v384_v4 = vrot.slane %v383_v3, 4  ;;  %1404 = vmatprep.subr.mxu0 %v1587_v47 }
  0x30   : > { %v391_v5 = vsel %vm390_vm1, %v380_v2, 0.0  ;;  %v996_v2 = vcombine.high %v1715_v0, %v1715_v0 }
  0x31   : > { %v385_v6 = vadd.f32 %v384_v4, %v383_v3  ;;  %v392_v7 = vrot.slane %v391_v5, 4 }
  0x32   : > { %1331 = vmatprep.mubr.msk.f32.mxu1 %vm997_vm3, %v996_v2 }
  0x33   : > { %v386_v8 = vrot.slane %v385_v6, 2  ;;  %v393_v9 = vadd.f32 %v392_v7, %v391_v5 }
  0x35   : > { %v387_v10 = vadd.f32 %v386_v8, %v385_v6  ;;  %v394_v11 = vrot.slane %v393_v9, 2 }
  0x37   : > { %v388_v12 = vrot.slane %v387_v10, 1  ;;  %v395_v13 = vadd.f32 %v394_v11, %v393_v9 }
  0x39   : > { %v389_v14 = vadd.f32 %v388_v12, %v387_v10  ;;  %v396_v15 = vrot.slane %v395_v13, 1 }
  0x3b   : > { %v397_v16 = vadd.f32 %v396_v15, %v395_v13  ;;  %1481 = vrsqrt.f32 %v389_v14 }
  0x3d   : > { %1483 = vrsqrt.f32 %v397_v16 }
  0x48   : > { %v1482_v17 = vpop.eup %1481 }
  0x4a   : > { %v1484_v18 = vpop.eup %1483 }
  0x4b   : > { %v402_v19 = vcombine.low %v1482_v17, %v1484_v18 }
  0x4d   : > { %v404_v20 = vmul.f32 %v402_v19, %v1715_v0 }
  0x4f   : > { %408 = vxpose.xlu0.b32.start.end [1/1] (short) %v404_v20, 128  ;;  %v406_v22 = vcombine.high %v404_v20, %v404_v20 }
  0x8c   : > { %440 = vxpose.xlu0.b32.start.end [1/1] (short) (narrow) %v406_v22, 64 }
  0xcb   : > { %v424_v23 = vpop.trf.xlu0 }
  0xcc   : > { %1368 = vmatprep.mubr.msk.f32.mxu0 %vm2302_vm2, %v424_v23 }
  0xcf   : > { %v425_v24 = vpop.trf.xlu0 }
  0xd0   : > { %1369 = vmatmul.mubr.msk.f32.vlgmr.msra.gmra.mxu0 %vm2302_vm2, %v425_v24 }
  0xd3   : > { %v426_v25 = vpop.trf.xlu0 }
  0xd4   : > { %1371 = vmatprep.mubr.msk.f32.mxu0 %vm2302_vm2, %v426_v25 }
  0xd7   : > { %v427_v26 = vpop.trf.xlu0 }
  0xd8   : > { %1372 = vmatmul.mubr.msk.f32.gmra.mxu0 %vm2302_vm2, %v427_v26 }
  0xdb   : > { %v428_v27 = vpop.trf.xlu0 }
  0xdc   : > { %1374 = vmatprep.mubr.msk.f32.mxu0 %vm2302_vm2, %v428_v27 }
  0xdf   : > { %v429_v28 = vpop.trf.xlu0 }
  0xe0   : > { %1375 = vmatmul.mubr.msk.f32.gmra.mxu0 %vm2302_vm2, %v429_v28 }
  0xe3   : > { %v430_v29 = vpop.trf.xlu0 }
  0xe4   : > { %1377 = vmatprep.mubr.msk.f32.mxu0 %vm2302_vm2, %v430_v29 }
  0xe7   : > { %v431_v30 = vpop.trf.xlu0 }
  0xe8   : > { %1378 = vmatmul.mubr.msk.f32.gmra.mxu0 %vm2302_vm2, %v431_v30 }
  0xeb   : > { %v432_v31 = vpop.trf.xlu0 }
  0xec   : > { %1380 = vmatprep.mubr.msk.f32.mxu0 %vm2302_vm2, %v432_v31 }
  0xef   : > { %v433_v32 = vpop.trf.xlu0 }
  0xf0   : > { %1381 = vmatmul.mubr.msk.f32.gmra.mxu0 %vm2302_vm2, %v433_v32 }
  0xf3   : > { %v434_v33 = vpop.trf.xlu0 }
  0xf4   : > { %1383 = vmatprep.mubr.msk.f32.mxu0 %vm2302_vm2, %v434_v33  ;;  %v352_v33 = vlaneseq }
  0xf7   : > { %v435_v34 = vpop.trf.xlu0 }
  0xf8   : > { %1384 = vmatmul.mubr.msk.f32.gmra.mxu0 %vm2302_vm2, %v435_v34 }
  0xfb   : > { %v436_v35 = vpop.trf.xlu0 }
  0xfc   : > { %1386 = vmatprep.mubr.msk.f32.mxu0 %vm2302_vm2, %v436_v35 }
  0xff   : > { %v437_v36 = vpop.trf.xlu0 }
 0x100   : > { %1387 = vmatmul.mubr.msk.f32.gmra.mxu0 %vm2302_vm2, %v437_v36  ;;  %v1837_v36 = vshrl.u32 %v352_v33, 7 }
 0x102   : > { %v1861_v2 = vadd.s32 64, %v1837_v36 }
 0x103   : > { %v438_v37 = vpop.trf.xlu0 }
 0x104   : > { %1389 = vmatprep.mubr.msk.f32.mxu0 %vm2302_vm2, %v438_v37 }
 0x107   : > { %v439_v38 = vpop.trf.xlu0 }
 0x108   : > { %1390 = vmatmul.mubr.msk.f32.gmra.mxu0 %vm2302_vm2, %v439_v38 }
 0x10b   : > { %v456_v39 = vpop.trf.xlu0 }
 0x10c   : > { %1392 = vmatprep.mubr.msk.f32.mxu0 %vm2302_vm2, %v456_v39  ;;  %v1840_v39 = vadd.s32 8, %v1837_v36 }
 0x10f   : > { %v457_v40 = vpop.trf.xlu0 }
 0x110   : > { %1393 = vmatmul.mubr.msk.f32.gmra.mxu0 %vm2302_vm2, %v457_v40  ;;  %v1843_v40 = vadd.s32 16, %v1837_v36 }
 0x113   : > { %v458_v41 = vpop.trf.xlu0 }
 0x114   : > { %1395 = vmatprep.mubr.msk.f32.mxu0 %vm2302_vm2, %v458_v41  ;;  %v1846_v41 = vadd.s32 24, %v1837_v36 }
 0x117   : > { %v459_v42 = vpop.trf.xlu0 }
 0x118   : > { %1396 = vmatmul.mubr.msk.f32.gmra.mxu0 %vm2302_vm2, %v459_v42  ;;  %v1849_v42 = vadd.s32 32, %v1837_v36 }
 0x11b   : > { %v460_v43 = vpop.trf.xlu0 }
 0x11c   : > { %1398 = vmatprep.mubr.msk.f32.mxu0 %vm2302_vm2, %v460_v43  ;;  %v1852_v43 = vadd.s32 40, %v1837_v36 }
 0x11f   : > { %v461_v44 = vpop.trf.xlu0 }
 0x120   : > { %1399 = vmatmul.mubr.msk.f32.gmra.mxu0 %vm2302_vm2, %v461_v44 }
 0x123   : > { %v462_v45 = vpop.trf.xlu0 }
 0x124   : > { %1401 = vmatprep.mubr.msk.f32.mxu0 %vm2302_vm2, %v462_v45  ;;  %v1855_v45 = vadd.s32 48, %v1837_v36 }
 0x127   : > { %v463_v46 = vpop.trf.xlu0 }
 0x128   : > { %1402 = vmatmul.mubr.msk.f32.gmra.mxu0 %vm2302_vm2, %v463_v46  ;;  %v1858_v46 = vadd.s32 56, %v1837_v36 }
 0x190   : > { %v1757_v48 = vpop.f32.mrf.mxu0 }
 0x192   : > { %v1759_v49 = vpop.f32.mrf.mxu0 }
 0x198   : > { %v1761_v50 = vpop.f32.mrf.mxu0 }
 0x19a   : > { %v1763_v51 = vpop.f32.mrf.mxu0 }
 0x1a0   : > { %v1765_v52 = vpop.f32.mrf.mxu0 }
 0x1a1   : > { %v734_v8 = vmax.f32 %v1757_v48, %v1765_v52 }
 0x1a2   : > { %v1767_v53 = vpop.f32.mrf.mxu0 }
 0x1a3   : > { %v733_v6 = vmax.f32 %v1759_v49, %v1767_v53 }
 0x1a8   : > { %v1769_v54 = vpop.f32.mrf.mxu0 }
 0x1a9   : > { %v736_v9 = vmax.f32 %v1761_v50, %v1769_v54 }
 0x1aa   : > { %v1771_v55 = vpop.f32.mrf.mxu0 }
 0x1ab   : > { %v735_v10 = vmax.f32 %v1763_v51, %v1771_v55 }
 0x1b0   : > { %v1773_v56 = vpop.f32.mrf.mxu0 }
 0x1b1   : > { %v738_v12 = vmax.f32 %v734_v8, %v1773_v56  ;;  %v1867_v8 = vadd.s32 80, %v1837_v36 }
 0x1b2   : > { %v1775_v57 = vpop.f32.mrf.mxu0 }
 0x1b3   : > { %v737_v11 = vmax.f32 %v733_v6, %v1775_v57  ;;  %v1864_v6 = vadd.s32 72, %v1837_v36 }
 0x1b8   : > { %v1777_v58 = vpop.f32.mrf.mxu0 }
 0x1b9   : > { %v740_v13 = vmax.f32 %v736_v9, %v1777_v58  ;;  %v1870_v9 = vadd.s32 88, %v1837_v36 }
 0x1ba   : > { %v1779_v59 = vpop.f32.mrf.mxu0 }
 0x1bb   : > { %v739_v14 = vmax.f32 %v735_v10, %v1779_v59  ;;  %v1873_v10 = vadd.s32 96, %v1837_v36 }
 0x1c0   : > { %v1781_v60 = vpop.f32.mrf.mxu0 }
 0x1c1   : > { %v742_v17 = vmax.f32 %v738_v12, %v1781_v60  ;;  %v1876_v12 = vadd.s32 104, %v1837_v36 }
 0x1c2   : > { %v1783_v61 = vpop.f32.mrf.mxu0 }
 0x1c3   : > { %v741_v15 = vmax.f32 %v737_v11, %v1783_v61 }
 0x1c8   : > { %v1785_v62 = vpop.f32.mrf.mxu0 }
 0x1c9   : > { %v744_v18 = vmax.f32 %v740_v13, %v1785_v62  ;;  %v1879_v13 = vadd.s32 112, %v1837_v36 }
 0x1ca   : > { %v1791_v63 = vpop.f32.mrf.mxu0 }
 0x1cb   : > { %v743_v19 = vmax.f32 %v739_v14, %v1791_v63  ;;  %v1882_v14 = vadd.s32 120, %v1837_v36 }
 0x1d0   : > { %v1793_v1 = vpop.f32.mrf.mxu0 }
 0x1d1   : > { %v746_v23 = vmax.f32 %v742_v17, %v1793_v1  ;;  %v1888_v17 = vadd.s32 136, %v1837_v36 }
 0x1d2   : > { %v1799_v3 = vpop.f32.mrf.mxu0 }
 0x1d3   : > { %v745_v20 = vmax.f32 %v741_v15, %v1799_v3  ;;  %v1885_v15 = vadd.s32 128, %v1837_v36 }
 0x1d8   : > { %v1801_v4 = vpop.f32.mrf.mxu0 }
 0x1d9   : > { %v748_v24 = vmax.f32 %v744_v18, %v1801_v4  ;;  %v1891_v18 = vadd.s32 144, %v1837_v36 }
 0x1da   : > { %v1803_v5 = vpop.f32.mrf.mxu0 }
 0x1db   : > { %v747_v25 = vmax.f32 %v743_v19, %v1803_v5  ;;  %v1894_v19 = vadd.s32 152, %v1837_v36 }
 0x1e0   : > { %v1807_v7 = vpop.f32.mrf.mxu0 }
 0x1e1   : > { %v750_v28 = vmax.f32 %v746_v23, %v1807_v7  ;;  %v1899_v23 = vadd.s32 160, %v1837_v36 }
 0x1e2   : > { %v1820_v16 = vpop.f32.mrf.mxu0 }
 0x1e3   : > { %v749_v26 = vmax.f32 %v745_v20, %v1820_v16 }
 0x1e5   : > { %v753_v31 = vmax.f32 %v749_v26, %v750_v28  ;;  %v1908_v26 = vadd.s32 184, %v1837_v36 }
 0x1e8   : > { %v1826_v22 = vpop.f32.mrf.mxu0 }
 0x1e9   : > { %v752_v29 = vmax.f32 %v748_v24, %v1826_v22  ;;  %v1902_v24 = vadd.s32 168, %v1837_v36 }
 0x1ea   : > { %v1832_v27 = vpop.f32.mrf.mxu0 }
 0x1eb   : > { %v751_v30 = vmax.f32 %v747_v25, %v1832_v27  ;;  %v1905_v25 = vadd.s32 176, %v1837_v36 }
 0x1ed   : > { %v754_v32 = vmax.f32 %v751_v30, %v752_v29 }
 0x1ef   : > { %v755_v34 = vmax.f32 %v753_v31, %v754_v32 }
 0x1f1   : > { %v756_v35 = vrot.slane %v755_v34, 4 }
 0x1f3   : > { %v757_v37 = vmax.f32 %v755_v34, %v756_v35 }
 0x1f5   : > { %v758_v38 = vrot.slane %v757_v37, 2 }
 0x1f7   : > { %v759_v44 = vmax.f32 %v757_v37, %v758_v38 }
 0x1f9   : > { %v760_v11 = vrot.slane %v759_v44, 1 }
 0x1fb   : > { %v1896_v20 = vmax.f32 %v759_v44, %v760_v11 }
 0x1fd   : > { %vm762_vm4 = vcmp.eq.f32.partialorder %v1759_v49, %v1896_v20  ;;  %vm763_vm5 = vcmp.eq.f32.partialorder %v1757_v48, %v1896_v20  ;;  %vm764_vm6 = vcmp.eq.f32.partialorder %v1763_v51, %v1896_v20  ;;  %vm765_vm7 = vcmp.eq.f32.partialorder %v1761_v50, %v1896_v20 }
 0x1fe   : > { %vm766_vm8 = vcmp.eq.f32.partialorder %v1767_v53, %v1896_v20  ;;  %vm767_vm9 = vcmp.eq.f32.partialorder %v1765_v52, %v1896_v20  ;;  %vm768_vm10 = vcmp.eq.f32.partialorder %v1771_v55, %v1896_v20  ;;  %vm769_vm11 = vcmp.eq.f32.partialorder %v1769_v54, %v1896_v20 }
 0x1ff   : > { %vm770_vm12 = vcmp.eq.f32.partialorder %v1775_v57, %v1896_v20  ;;  %vm779_vm14 = vcmp.eq.f32.partialorder %v1793_v1, %v1896_v20  ;;  %vm780_vm15 = vcmp.eq.f32.partialorder %v1803_v5, %v1896_v20  ;;  %vm781_vm1 = vcmp.eq.f32.partialorder %v1801_v4, %v1896_v20 }
 0x200   : > { %vm782_vm3 = vcmp.eq.f32.partialorder %v1820_v16, %v1896_v20  ;;  %vm783_vm2 = vcmp.eq.f32.partialorder %v1807_v7, %v1896_v20  ;;  %vm784_vm0 = vcmp.eq.f32.partialorder %v1832_v27, %v1896_v20  ;;  %vm785_vm13 = vcmp.eq.f32.partialorder %v1826_v22, %v1896_v20 }
 0x201   : > { %v786_v28 = vsel %vm762_vm4, %v1837_v36, 192  ;;  %v787_v29 = vsel %vm763_vm5, %v1840_v39, 192  ;;  %v788_v30 = vsel %vm764_vm6, %v1843_v40, 192  ;;  %v789_v31 = vsel %vm765_vm7, %v1846_v41, 192 }
 0x202   : > { %v790_v49 = vsel %vm766_vm8, %v1849_v42, 192  ;;  %v791_v48 = vsel %vm767_vm9, %v1852_v43, 192  ;;  %v792_v51 = vsel %vm768_vm10, %v1855_v45, 192  ;;  %v793_v50 = vsel %vm769_vm11, %v1858_v46, 192 }
 0x203   : > { %v794_v53 = vsel %vm770_vm12, %v1861_v2, 192  ;;  %vm2308_vm4 = vcmp.eq.f32.partialorder %v1773_v56, %v1896_v20  ;;  %vm2309_vm5 = vcmp.eq.f32.partialorder %v1779_v59, %v1896_v20  ;;  %vm2310_vm6 = vcmp.eq.f32.partialorder %v1777_v58, %v1896_v20 }
 0x204   : > { %v795_v52 = vsel %vm2308_vm4, %v1864_v6, 192  ;;  %v796_v55 = vsel %vm2309_vm5, %v1867_v8, 192  ;;  %v797_v54 = vsel %vm2310_vm6, %v1870_v9, 192  ;;  %vm2311_vm7 = vcmp.eq.f32.partialorder %v1783_v61, %v1896_v20 }
 0x205   : > { %v798_v57 = vsel %vm2311_vm7, %v1873_v10, 192  ;;  %vm2312_vm8 = vcmp.eq.f32.partialorder %v1781_v60, %v1896_v20  ;;  %vm2313_vm9 = vcmp.eq.f32.partialorder %v1791_v63, %v1896_v20  ;;  %vm2314_vm10 = vcmp.eq.f32.partialorder %v1785_v62, %v1896_v20 }
 0x206   : > { %v799_v56 = vsel %vm2312_vm8, %v1876_v12, 192  ;;  %v800_v59 = vsel %vm2313_vm9, %v1879_v13, 192  ;;  %v801_v58 = vsel %vm2314_vm10, %v1882_v14, 192  ;;  %vm2315_vm11 = vcmp.eq.f32.partialorder %v1799_v3, %v1896_v20 }
 0x207   : > { %v802_v61 = vsel %vm2315_vm11, %v1885_v15, 192  ;;  %v803_v60 = vsel %vm779_vm14, %v1888_v17, 192  ;;  %v804_v63 = vsel %vm780_vm15, %v1891_v18, 192  ;;  %v805_v62 = vsel %vm781_vm1, %v1894_v19, 192 }
 0x208   : > { %v806_v3 = vsel %vm782_vm3, %v1899_v23, 192  ;;  %v807_v1 = vsel %vm783_vm2, %v1902_v24, 192  ;;  %v808_v5 = vsel %vm784_vm0, %v1905_v25, 192  ;;  %v809_v4 = vsel %vm785_vm13, %v1908_v26, 192 }
 0x209   : > { %vm810_vm12 = vcmp.lt.s32.totalorder %v786_v28, %v790_v49  ;;  %vm812_vm14 = vcmp.lt.s32.totalorder %v787_v29, %v791_v48  ;;  %vm814_vm15 = vcmp.lt.s32.totalorder %v788_v30, %v792_v51  ;;  %vm816_vm1 = vcmp.lt.s32.totalorder %v789_v31, %v793_v50 }
 0x20a   : > { %v811_v16 = vsel %vm810_vm12, %v786_v28, %v790_v49  ;;  %v813_v32 = vsel %vm812_vm14, %v787_v29, %v791_v48  ;;  %v815_v33 = vsel %vm814_vm15, %v788_v30, %v792_v51  ;;  %v817_v34 = vsel %vm816_vm1, %v789_v31, %v793_v50 }
 0x20b   : > { %vm818_vm3 = vcmp.lt.s32.totalorder %v811_v16, %v794_v53  ;;  %vm820_vm2 = vcmp.lt.s32.totalorder %v813_v32, %v795_v52  ;;  %vm822_vm4 = vcmp.lt.s32.totalorder %v815_v33, %v796_v55  ;;  %vm824_vm5 = vcmp.lt.s32.totalorder %v817_v34, %v797_v54 }
 0x20c   : > { %v819_v7 = vsel %vm818_vm3, %v811_v16, %v794_v53  ;;  %v821_v27 = vsel %vm820_vm2, %v813_v32, %v795_v52  ;;  %v823_v35 = vsel %vm822_vm4, %v815_v33, %v796_v55  ;;  %v825_v37 = vsel %vm824_vm5, %v817_v34, %v797_v54 }
 0x20d   : > { %vm826_vm0 = vcmp.lt.s32.totalorder %v819_v7, %v798_v57  ;;  %vm828_vm6 = vcmp.lt.s32.totalorder %v821_v27, %v799_v56  ;;  %vm830_vm7 = vcmp.lt.s32.totalorder %v823_v35, %v800_v59  ;;  %vm832_vm13 = vcmp.lt.s32.totalorder %v825_v37, %v801_v58 }
 0x20e   : > { %v827_v22 = vsel %vm826_vm0, %v819_v7, %v798_v57  ;;  %v829_v38 = vsel %vm828_vm6, %v821_v27, %v799_v56  ;;  %v831_v44 = vsel %vm830_vm7, %v823_v35, %v800_v59  ;;  %v833_v11 = vsel %vm832_vm13, %v825_v37, %v801_v58  ;;  %v2057_v59 = vld [vmem:[%s2295_s1] ss:$0 sm:$0xff] }
 0x20f   : > { %vm834_vm8 = vcmp.lt.s32.totalorder %v827_v22, %v802_v61  ;;  %vm836_vm9 = vcmp.lt.s32.totalorder %v829_v38, %v803_v60  ;;  %vm838_vm10 = vcmp.lt.s32.totalorder %v831_v44, %v804_v63  ;;  %vm840_vm11 = vcmp.lt.s32.totalorder %v833_v11, %v805_v62 }
 0x210   : > { %v835_v28 = vsel %vm834_vm8, %v827_v22, %v802_v61  ;;  %v837_v29 = vsel %vm836_vm9, %v829_v38, %v803_v60  ;;  %v839_v30 = vsel %vm838_vm10, %v831_v44, %v804_v63  ;;  %v841_v31 = vsel %vm840_vm11, %v833_v11, %v805_v62 }
 0x211   : > { %vm842_vm12 = vcmp.lt.s32.totalorder %v835_v28, %v806_v3  ;;  %vm844_vm14 = vcmp.lt.s32.totalorder %v837_v29, %v807_v1  ;;  %vm846_vm15 = vcmp.lt.s32.totalorder %v839_v30, %v808_v5  ;;  %vm848_vm1 = vcmp.lt.s32.totalorder %v841_v31, %v809_v4 }
 0x212   : > { %v843_v49 = vsel %vm842_vm12, %v835_v28, %v806_v3  ;;  %v845_v48 = vsel %vm844_vm14, %v837_v29, %v807_v1  ;;  %v847_v51 = vsel %vm846_vm15, %v839_v30, %v808_v5  ;;  %v849_v50 = vsel %vm848_vm1, %v841_v31, %v809_v4 }
 0x213   : > { %vm850_vm3 = vcmp.lt.s32.totalorder %v843_v49, %v845_v48  ;;  %vm852_vm2 = vcmp.lt.s32.totalorder %v847_v51, %v849_v50  ;;  %vm937_vm6 = vcmp.eq.s32.totalorder %v1882_v14, %v2057_v59  ;;  %v2062_v60 = vstv %s1789_s19  ;;  %s331_s19 = scalar_lea.vmem [#allocation5], %s1300_s17 }
 0x214   : > { %v851_v53 = vsel %vm850_vm3, %v843_v49, %v845_v48  ;;  %v853_v52 = vsel %vm852_vm2, %v847_v51, %v849_v50  ;;  %vm865_vm13 = vcmp.gt.f32.partialorder %v1896_v20, -inf  ;;  %v2066_v62 = vstv %s1787_s18  ;;  %s1335_s18 = sshll.u32 %s1576_s27, 7  ;;  %s1510_s27 = scalar_lea.vmem %s1509_s12, 256 }
 0x215   : > { %vm854_vm4 = vcmp.lt.s32.totalorder %v851_v53, %v853_v52  ;;  %vm936_vm8 = vcmp.eq.s32.totalorder %v1879_v13, %v2057_v59  ;;  %v962_v1 = vsel %vm937_vm6, %v2062_v60, 0.0  ;;  %vm935_vm12 = vcmp.eq.s32.totalorder %v1876_v12, %v2057_v59  ;;  %s1183_s23 = scalar_lea.hbm %s2301_s7, %s1335_s18 }
 0x216   : > { %v855_v55 = vsel %vm854_vm4, %v851_v53, %v853_v52  ;;  %v961_v4 = vsel %vm936_vm8, %v2062_v60, 0.0  ;;  %vm934_vm15 = vcmp.eq.s32.totalorder %v1873_v10, %v2057_v59  ;;  %vm933_vm3 = vcmp.eq.s32.totalorder %v1870_v9, %v2057_v59 }
 0x217   : > { %v856_v54 = vrot.slane %v855_v55, 4  ;;  %v959_v33 = vsel %vm934_vm15, %v2062_v60, 0.0  ;;  %vm932_vm4 = vcmp.eq.s32.totalorder %v1867_v8, %v2057_v59  ;;  %vm927_vm15 = vcmp.eq.s32.totalorder %v1852_v43, %v2057_v59 }
 0x218   : > { %v952_v48 = vsel %vm927_vm15, %v2062_v60, 0.0  ;;  %vm943_vm15 = vcmp.eq.s32.totalorder %v1902_v24, %v2057_v59 }
 0x219   : > { %vm857_vm5 = vcmp.lt.s32.totalorder %v855_v55, %v856_v54 }
 0x21a   : > { %v858_v57 = vsel %vm857_vm5, %v855_v55, %v856_v54 }
 0x21b   : > { %v859_v56 = vrot.slane %v858_v57, 2 }
 0x21d   : > { %vm860_vm0 = vcmp.lt.s32.totalorder %v858_v57, %v859_v56 }
 0x21e   : > { %v861_v58 = vsel %vm860_vm0, %v858_v57, %v859_v56  ;;  %vm931_vm0 = vcmp.eq.s32.totalorder %v1864_v6, %v2057_v59 }
 0x21f   : > { %v862_v61 = vrot.slane %v861_v58, 1 }
 0x221   : > { %vm863_vm7 = vcmp.lt.s32.totalorder %v861_v58, %v862_v61 }
 0x222   : > { %v864_v63 = vsel %vm863_vm7, %v861_v58, %v862_v61  ;;  %vm930_vm7 = vcmp.eq.s32.totalorder %v1861_v2, %v2057_v59 }
 0x223   : > { %v2070_v3 = vsel %vm865_vm13, %v864_v63, 0  ;;  %vm940_vm13 = vcmp.eq.s32.totalorder %v1891_v18, %v2057_v59  ;;  %v955_v38 = vsel %vm930_vm7, %v2062_v60, 0.0  ;;  %vm923_vm7 = vcmp.eq.s32.totalorder %v1840_v39, %v2057_v59 }
 0x224   : > { %vm884_vm9 = vcmp.eq.s32.totalorder %v1882_v14, %v2070_v3  ;;  %vm883_vm10 = vcmp.eq.s32.totalorder %v1879_v13, %v2070_v3  ;;  %vm882_vm11 = vcmp.eq.s32.totalorder %v1876_v12, %v2070_v3  ;;  %vm881_vm14 = vcmp.eq.s32.totalorder %v1873_v10, %v2070_v3 }
 0x225   : > { %v909_v20 = vsel %vm884_vm9, %v2066_v62, 0.0  ;;  %v908_v5 = vsel %vm883_vm10, %v2066_v62, 0.0  ;;  %v907_v13 = vsel %vm882_vm11, %v2066_v62, 0.0  ;;  %v960_v14 = vsel %vm935_vm12, %v2062_v60, 0.0 }
 0x226   : > { %v986_v16 = vadd.f32 %v962_v1, %v909_v20  ;;  %v985_v32 = vadd.f32 %v961_v4, %v908_v5  ;;  %vm880_vm1 = vcmp.eq.s32.totalorder %v1870_v9, %v2070_v3  ;;  %v906_v12 = vsel %vm881_vm14, %v2066_v62, 0.0 }
 0x227   : > { %v984_v10 = vadd.f32 %v960_v14, %v907_v13  ;;  %vm879_vm2 = vcmp.eq.s32.totalorder %v1867_v8, %v2070_v3  ;;  %v905_v34 = vsel %vm880_vm1, %v2066_v62, 0.0  ;;  %v958_v9 = vsel %vm933_vm3, %v2062_v60, 0.0 }
 0x228   : > { %1001 = vmatpush1.msra.mxu1 %v986_v16  ;;  %v983_v7 = vadd.f32 %v959_v33, %v906_v12  ;;  %vm878_vm5 = vcmp.eq.s32.totalorder %v1864_v6, %v2070_v3  ;;  %v904_v27 = vsel %vm879_vm2, %v2066_v62, 0.0  ;;  %v957_v8 = vsel %vm932_vm4, %v2062_v60, 0.0 }
 0x229   : > { %1002 = vmatprep.subr.mxu1 %v1587_v47  ;;  %v982_v35 = vadd.f32 %v958_v9, %v905_v34  ;;  %vm877_vm6 = vcmp.eq.s32.totalorder %v1861_v2, %v2070_v3  ;;  %v903_v37 = vsel %vm878_vm5, %v2066_v62, 0.0  ;;  %v956_v6 = vsel %vm931_vm0, %v2062_v60, 0.0 }
 0x22a   : > { %1003 = vmatpush1.msra.mxu1 %v985_v32  ;;  %v981_v22 = vadd.f32 %v957_v8, %v904_v27  ;;  %vm876_vm8 = vcmp.eq.s32.totalorder %v1858_v46, %v2070_v3  ;;  %vm929_vm9 = vcmp.eq.s32.totalorder %v1858_v46, %v2057_v59  ;;  %v902_v2 = vsel %vm877_vm6, %v2066_v62, 0.0 }
 0x22b   : > { %1004 = vmatprep.subr.mxu1 %v1587_v47  ;;  %v980_v44 = vadd.f32 %v956_v6, %v903_v37  ;;  %vm875_vm10 = vcmp.eq.s32.totalorder %v1855_v45, %v2070_v3  ;;  %vm928_vm11 = vcmp.eq.s32.totalorder %v1855_v45, %v2057_v59  ;;  %v965_v11 = vsel %vm940_vm13, %v2062_v60, 0.0 }
 0x22c   : > { %1005 = vmatpush1.msra.mxu1 %v984_v10  ;;  %v901_v46 = vsel %vm876_vm8, %v2066_v62, 0.0  ;;  %v954_v28 = vsel %vm929_vm9, %v2062_v60, 0.0  ;;  %vm887_vm12 = vcmp.eq.s32.totalorder %v1891_v18, %v2070_v3  ;;  %v979_v29 = vadd.f32 %v955_v38, %v902_v2 }
 0x22d   : > { %1006 = vmatprep.subr.mxu1 %v1587_v47  ;;  %vm874_vm14 = vcmp.eq.s32.totalorder %v1852_v43, %v2070_v3  ;;  %v912_v45 = vsel %vm887_vm12, %v2066_v62, 0.0  ;;  %v900_v30 = vsel %vm875_vm10, %v2066_v62, 0.0  ;;  %v953_v31 = vsel %vm928_vm11, %v2062_v60, 0.0 }
 0x22e   : > { %1007 = vmatpush1.msra.mxu1 %v983_v7  ;;  %v2145_v49 = vadd.f32 %v965_v11, %v912_v45  ;;  %v978_v18 = vadd.f32 %v954_v28, %v901_v46  ;;  %vm873_vm1 = vcmp.eq.s32.totalorder %v1849_v42, %v2070_v3  ;;  %vm926_vm3 = vcmp.eq.s32.totalorder %v1849_v42, %v2057_v59 }
 0x22f   : > { %1008 = vmatprep.subr.mxu1 %v1587_v47  ;;  %v899_v43 = vsel %vm874_vm14, %v2066_v62, 0.0  ;;  %v977_v51 = vadd.f32 %v953_v31, %v900_v30  ;;  %vm872_vm2 = vcmp.eq.s32.totalorder %v1846_v41, %v2070_v3  ;;  %vm925_vm4 = vcmp.eq.s32.totalorder %v1846_v41, %v2057_v59 }
 0x230   : > { %1009 = vmatpush1.msra.mxu1 %v982_v35  ;;  %v898_v50 = vsel %vm873_vm1, %v2066_v62, 0.0  ;;  %v951_v42 = vsel %vm926_vm3, %v2062_v60, 0.0  ;;  %v976_v53 = vadd.f32 %v952_v48, %v899_v43  ;;  %vm871_vm5 = vcmp.eq.s32.totalorder %v1843_v40, %v2070_v3 }
 0x231   : > { %1010 = vmatprep.subr.mxu1 %v1587_v47  ;;  %vm924_vm0 = vcmp.eq.s32.totalorder %v1843_v40, %v2057_v59  ;;  %v897_v52 = vsel %vm872_vm2, %v2066_v62, 0.0  ;;  %v950_v41 = vsel %vm925_vm4, %v2062_v60, 0.0  ;;  %v975_v55 = vadd.f32 %v951_v42, %v898_v50 }
 0x232   : > { %1011 = vmatpush1.msra.mxu1 %v981_v22  ;;  %vm870_vm6 = vcmp.eq.s32.totalorder %v1840_v39, %v2070_v3  ;;  %v896_v54 = vsel %vm871_vm5, %v2066_v62, 0.0  ;;  %v949_v40 = vsel %vm924_vm0, %v2062_v60, 0.0  ;;  %v974_v57 = vadd.f32 %v950_v41, %v897_v52 }
 0x233   : > { %1012 = vmatprep.subr.mxu1 %v1587_v47  ;;  %vm869_vm13 = vcmp.eq.s32.totalorder %v1837_v36, %v2070_v3  ;;  %vm922_vm8 = vcmp.eq.s32.totalorder %v1837_v36, %v2057_v59  ;;  %v895_v56 = vsel %vm870_vm6, %v2066_v62, 0.0  ;;  %v948_v39 = vsel %vm923_vm7, %v2062_v60, 0.0 }
 0x234   : > { %1013 = vmatpush1.msra.mxu1 %v980_v44  ;;  %v973_v58 = vadd.f32 %v949_v40, %v896_v54  ;;  %vm892_vm9 = vcmp.eq.s32.totalorder %v1908_v26, %v2070_v3  ;;  %vm945_vm10 = vcmp.eq.s32.totalorder %v1908_v26, %v2057_v59  ;;  %v894_v61 = vsel %vm869_vm13, %v2066_v62, 0.0 }
 0x235   : > { %1014 = vmatprep.subr.mxu1 %v1587_v47  ;;  %v947_v36 = vsel %vm922_vm8, %v2062_v60, 0.0  ;;  %v972_v63 = vadd.f32 %v948_v39, %v895_v56  ;;  %vm891_vm11 = vcmp.eq.s32.totalorder %v1905_v25, %v2070_v3  ;;  %vm944_vm12 = vcmp.eq.s32.totalorder %v1905_v25, %v2057_v59 }
 0x236   : > { %1015 = vmatpush1.msra.mxu1 %v979_v29  ;;  %v917_v1 = vsel %vm892_vm9, %v2066_v62, 0.0  ;;  %v970_v26 = vsel %vm945_vm10, %v2062_v60, 0.0  ;;  %v971_v20 = vadd.f32 %v947_v36, %v894_v61  ;;  %vm890_vm14 = vcmp.eq.s32.totalorder %v1902_v24, %v2070_v3 }
 0x237   : > { %1016 = vmatprep.subr.mxu1 %v1587_v47  ;;  %v916_v5 = vsel %vm891_vm11, %v2066_v62, 0.0  ;;  %v969_v25 = vsel %vm944_vm12, %v2062_v60, 0.0  ;;  %v994_v4 = vadd.f32 %v970_v26, %v917_v1  ;;  %vm889_vm1 = vcmp.eq.s32.totalorder %v1899_v23, %v2070_v3 }
 0x238   : > { %1017 = vmatpush1.msra.mxu1 %v978_v18  ;;  %vm942_vm3 = vcmp.eq.s32.totalorder %v1899_v23, %v2057_v59  ;;  %v915_v16 = vsel %vm890_vm14, %v2066_v62, 0.0  ;;  %v968_v24 = vsel %vm943_vm15, %v2062_v60, 0.0  ;;  %v993_v13 = vadd.f32 %v969_v25, %v916_v5 }
 0x239   : > { %1018 = vmatprep.subr.mxu1 %v1587_v47  ;;  %vm888_vm2 = vcmp.eq.s32.totalorder %v1894_v19, %v2070_v3  ;;  %vm941_vm4 = vcmp.eq.s32.totalorder %v1894_v19, %v2057_v59  ;;  %v914_v14 = vsel %vm889_vm1, %v2066_v62, 0.0  ;;  %v967_v23 = vsel %vm942_vm3, %v2062_v60, 0.0 }
 0x23a   : > { %1019 = vmatpush1.msra.mxu1 %v977_v51  ;;  %v992_v32 = vadd.f32 %v968_v24, %v915_v16  ;;  %v913_v12 = vsel %vm888_vm2, %v2066_v62, 0.0  ;;  %v966_v33 = vsel %vm941_vm4, %v2062_v60, 0.0  ;;  %v991_v10 = vadd.f32 %v967_v23, %v914_v14 }
 0x23b   : > { %1020 = vmatprep.subr.mxu1 %v1587_v47  ;;  %vm886_vm5 = vcmp.eq.s32.totalorder %v1888_v17, %v2070_v3  ;;  %vm939_vm0 = vcmp.eq.s32.totalorder %v1888_v17, %v2057_v59  ;;  %v990_v19 = vadd.f32 %v966_v33, %v913_v12  ;;  %vm885_vm6 = vcmp.eq.s32.totalorder %v1885_v15, %v2070_v3 }
 0x23c   : > { %1021 = vmatpush1.msra.mxu1 %v976_v53  ;;  %vm938_vm7 = vcmp.eq.s32.totalorder %v1885_v15, %v2057_v59  ;;  %v911_v34 = vsel %vm886_vm5, %v2066_v62, 0.0  ;;  %v964_v9 = vsel %vm939_vm0, %v2062_v60, 0.0  ;;  %v910_v17 = vsel %vm885_vm6, %v2066_v62, 0.0  ;;  %v1148_v59 = vld [vmem:[%s2299_s5] sm:$0xff] }
 0x23d   : > { %1022 = vmatprep.subr.mxu1 %v1587_v47  ;;  %v963_v7 = vsel %vm938_vm7, %v2062_v60, 0.0  ;;  %v988_v27 = vadd.f32 %v964_v9, %v911_v34  ;;  %vm1588_vm13 = vmmov 0   ;;  %v1589_v60 = vmov 0   ;;  %v1155_v62 = vld [vmem:[%s2300_s6] sm:$0xff] }
 0x23e   : > { %1023 = vmatpush1.msra.mxu1 %v975_v55  ;;  %v987_v15 = vadd.f32 %v963_v7, %v910_v17  ;;  %1406 = vmatprep.mubr.msk.f32.mxu0 %vm1588_vm13, %v1587_v47  ;;  %v867_v3 = vstv %s349_s20  ;;  %vm2316_vm8 = vcmask 1043456   ;;  %vm2317_vm9 = vcmask 31744   ;;  %s1185_s20 = sshll.u32 %s331_s19, 4  ;;  %s1186_s20 = int_to_ptr.vmem [resolvable:$true] %s1185_s20 }
 0x23f   : > { %1024 = vmatprep.subr.mxu1 %v1587_v47  ;;  %1478 = vset.pattern.permute.xlu1 %v1589_v60  ;;  %s1504_s8 = scalar_lea.vmem %s1186_s20, 128  ;;  %p1511_p0 = scmp.lt.s32.totalorder %s1186_s20, %s1509_s12 }
 0x240   : > { %1025 = vmatpush1.msra.mxu1 %v974_v57  ;;  %1479 = vset.pattern.permute.xlu0 %v1589_v60  ;;  %p1505_p10 = scmp.ne.s32.totalorder %s1186_s20, %s1504_s8  ;;  %p1512_p1 = scmp.lt.s32.totalorder %s1510_s27, %s1504_s8 }
 0x241   : > { %1026 = vmatprep.subr.mxu1 %v1587_v47  ;;  %1151 = vperm.xlu1 %1478, %v1148_v59  }
 0x242   : > { %1027 = vmatpush1.msra.mxu1 %v973_v58  ;;  %p1506_p11 = pnand %p1505_p10, %p1671_p4  ;;  %p1513_p2 = por %p1512_p1, %p1511_p0 }
 0x243   : > { %1028 = vmatprep.subr.mxu1 %v1587_v47 }
 0x244   : > { %1029 = vmatpush1.msra.mxu1 %v972_v63  ;;  %p1507_p13 = pneg %p1506_p11 }
 0x245   : > { %1030 = vmatprep.subr.mxu1 %v1587_v47  ;;  %1158 = vperm.xlu1 %1478, %v1155_v62  }
 0x246   : > { %1031 = vmatpush1.msra.mxu1 %v971_v20  ;;  %p1514_p3 = pnand %p1513_p2, %p1507_p13 }
 0x247   : > { %1048 = vmatprep.subr.mxu1 %v1587_v47 }
 0x248   : > { %1049 = vmatpush2.msra.mxu1 %v994_v4 }
 0x249   : > { %1050 = vmatprep.subr.mxu1 %v1587_v47 }
 0x24a   : > { %1051 = vmatpush2.msra.mxu1 %v993_v13 }
 0x24b   : > { %1052 = vmatprep.subr.mxu1 %v1587_v47 }
 0x24c   : > { %1053 = vmatpush2.msra.mxu1 %v992_v32 }
 0x24d   : > { %1054 = vmatprep.subr.mxu1 %v1587_v47 }
 0x24e   : > { %1055 = vmatpush2.msra.mxu1 %v991_v10 }
 0x24f   : > { %1056 = vmatprep.subr.mxu1 %v1587_v47 }
 0x250   : > { %1057 = vmatpush2.msra.mxu1 %v990_v19 }
 0x251   : > { %1058 = vmatprep.subr.mxu1 %v1587_v47 }
 0x252   : > { %1059 = vmatpush2.msra.mxu1 %v2145_v49 }
 0x253   : > { %1060 = vmatprep.subr.mxu1 %v1587_v47 }
 0x254   : > { %1061 = vmatpush2.msra.mxu1 %v988_v27 }
 0x255   : > { %1062 = vmatprep.subr.mxu1 %v1587_v47  ;;  %v1071_v47 = vld [vmem:[%s2298_s4] sm:$0xff] }
 0x256   : > { %1063 = vmatpush2.msra.mxu1 %v987_v15 }
 0x257   : > { %1065 = vmatmul.mubr.f32.vlgmr.msra.gmra.mxu1 %v1715_v0  ;;  %v868_v0 = vmul.f32 %v867_v3, %v1725_v21 }
 0x2bc   : > { %v1152_v6 = vpop.permute.xlu1 %1151 }
 0x2c0   : > { %v1159_v38 = vpop.permute.xlu1 %1158 }
 0x317   : > { %v1066_v8 = vpop.f32.mrf.mxu1 }
 0x318   : > { %v1070_v35 = vadd.f32 %v1066_v8, %v868_v0 }
 0x319   : > { %v1068_v37 = vpop.f32.mrf.mxu1 }
 0x31a   : > { %1405 = vmatpush3.msk.msra.mxu0 %vm2316_vm8, %v1070_v35 }
 0x31b   : > { %1407 = vmatmul.mubr.msk.f32.vlgmr.msra.gmra.mxu0 %vm2317_vm9, %v1071_v47 }
 0x3db   : > { %v1144_v22 = vpop.f32.mrf.mxu0 }
 0x3dc   : > { %v1154_v2 = vmul.f32 %v1152_v6, %v1144_v22 }
 0x3dd   : > { %v1408_v44 = vpop.f32.mrf.mxu0 }
 0x3de   : > { %v1161_v11 = vadd.f32 %v1159_v38, %v1154_v2 }
 0x3e0   : > { %v1162_v21 = vsub.f32 0.0, %v1161_v11 }
 0x3e2   : > { %v1163_v46 = vmul.f32 1.442695, %v1162_v21 }
 0x3e4   : > { %1485 = vpow2.f32 %v1163_v46 }
 0x3f1   : > { %v1486_v28 = vpop.eup %1485 }
 0x3f2   : > { %v1165_v29 = vadd.f32 1.0, %v1486_v28 }
 0x3f4   : > { %1487 = vrcp.f32 %v1165_v29 }
 0x401   : > { %v1488_v45 = vpop.eup %1487 }
 0x402   : > { %v1168_v30 = vmul.f32 %v1488_v45, %v1161_v11 }
 0x404   : > { %1169 = vst [vmem:[%s331_s19] sm:$0xff] %v1168_v30 }
 0x405   : > { %1517 = shalt.err (!%p1514_p3)
}
 0x406   : > { %s1518_s15 = scalar_lea.hbm %s1183_s23, 128  ;;  %s1522_s18 = scalar_lea.hbm %s2301_s7, 256 }
 0x407   : > { %p1519_p5 = scmp.ne.s32.totalorder %s1183_s23, %s1518_s15  ;;  %p1523_p9 = scmp.lt.s32.totalorder %s1183_s23, %s2301_s7 }
 0x408   : > { %p1524_p12 = scmp.lt.s32.totalorder %s1522_s18, %s1518_s15 }
 0x409   : > { %p1520_p6 = pnand %p1519_p5, %p1671_p4 }
 0x40a   : > { %p1525_p10 = por %p1524_p12, %p1523_p9 }
 0x40b   : > { %p1521_p7 = pneg %p1520_p6 }
 0x40d   : > { %p1526_p11 = pnand %p1525_p10, %p1521_p7 }
 0x40f   : > { %1529 = shalt.err (!%p1526_p11)
}
 0x410   : > { %1413 = dma.vmem_to_hbm [thread:$0]  (%p1671_p4), %s1186_s20, 128, %s1183_s23, %s1171_s30  }
 0x411 PF: > { %p1425_p13 = scmp.ge.s32.totalorder %s1584_s29, 2  ;;  %s1197_s22 = sand.u32 1, %s1564_s24  }
 0x412   : > { %s1198_s8 = scalar_lea.sflag [#allocation3], %s1197_s22 }
 0x413   : > { %p1420_p0 = pnand %p1425_p13, %p1678_p8 }
 0x415   : > { %p1421_p1 = pneg %p1420_p0 }
 0x417   : > { %1559 = dma.done.wait (%p1421_p1), %s1198_s8, 128  }
 0x418   : > { %1561 = vsyncadd (%p1421_p1), %s1198_s8, 4294967168  ;;  %s21_s29 = sadd.s32 1, %s1584_s29   ;;  %s2318_s24 = smov %s1568_s25 }
 0x419   : > { %p18_p2 = scmp.ge.s32.totalorder %s21_s29, 4   ;;  %s2319_s25 = smov %s1572_s26 }
 0x41a   : > { %s2320_s26 = smov %s1684_s14  ;;  %s2321_s27 = smov %s1580_s28 }
 0x41b   : > { %s2322_s28 = smov %s2324_s9  ;;  %20 = sbr.rel (!%p18_p2) target bundleno = 5 (0x5), region = 94 }
 0x420   :  { %1203 = vsyncpa [#allocation3], 1 }
 0x421   :  { %1205 = vsyncpa [#allocation3 + $0x1], 1 }
 0x422   :  { %1206 = vsyncpa [#allocation4], 1 }
 0x423   :  { %1208 = vsyncpa [#allocation4 + $0x1], 1 }

</bundles_post_ra>
